<compile_context>
chip_gen: v7x
topology: tpu7x:2x2x1
jax: 0.10.0
libtpu: 0.0.40
codegen_flags: <defaults>
</compile_context>

<pallas_src>
import jax
import jax.numpy as jnp
from jax.experimental import pallas as pl
from jax.experimental.pallas import tpu as pltpu


def _round_up(x: int, m: int) -> int:
    return ((x + m - 1) // m) * m


def gaussian_decoder_kernel(z_ref, w1_ref, b1_ref, w2_ref, b2_ref, mean_ref):
    # mean = relu(z @ W1 + b1) @ W2 + b2 ; all accumulation in f32 on the MXU.
    z = z_ref[...].astype(w1_ref.dtype)                                 # (TB, M)
    h = jnp.dot(z, w1_ref[...], preferred_element_type=jnp.float32)    # (TB, H)
    h = jnp.maximum(h + b1_ref[...], 0.0)                              # bias+ReLU f32 (VPU)
    h = h.astype(w2_ref.dtype)
    out = jnp.dot(h, w2_ref[...], preferred_element_type=jnp.float32)  # (TB, D)
    mean_ref[...] = (out + b2_ref[...]).astype(mean_ref.dtype)


def prepare_gaussian_decoder_params(w1, b1, w2, b2, *, compute_dtype=jnp.bfloat16):
    """One-time parameter preprocessing (do NOT call per forward).

    Casts the matmul operands to `compute_dtype` (bf16 halves the HBM->VMEM DMA
    for w2, the only non-trivial tensor; accumulation in the kernel stays f32).
    Pass compute_dtype=jnp.float32 for exact PyTorch f32 semantics.
    """
    return (
        w1.astype(compute_dtype),
        b1.reshape(1, -1).astype(jnp.float32),
        w2.astype(compute_dtype),
        b2.reshape(1, -1).astype(jnp.float32),
    )


def _choose_batch_tile(batch_padded: int, tb_max: int) -> int:
    # At least two grid steps once the batch allows it, so the "parallel" batch
    # axis can shard across v7x's two TensorCores; never exceed tb_max
    # (TB=1024 fits comfortably inside the scoped-VMEM budget on all gens).
    half = _round_up(pl.cdiv(batch_padded, 2), 8)
    return max(8, min(tb_max, half))


def gaussian_decoder_forward(z, params, log_std, *, tb_max=1024,
                             mean_dtype=jnp.float32):
    """Returns (mean, scale): parameters of td.Independent(td.Normal(mean, scale), 2)."""
    w1, b1, w2, b2 = params
    B, M = z.shape
    H = w1.shape[1]
    D = w2.shape[1]                          # 784 = 28 * 28

    # Sublane-align the batch only if needed (no-op in the common B % 8 == 0 case).
    Bp = _round_up(B, 8)
    zin = z if Bp == B else jnp.pad(z, ((0, Bp - B), (0, 0)))
    TB = _choose_batch_tile(Bp, tb_max)
    grid = (pl.cdiv(Bp, TB),)

    nbytes = lambda a: a.size * a.dtype.itemsize
    cost = pl.CostEstimate(
        flops=2 * Bp * (M * H + H * D),
        transcendentals=0,
        bytes_accessed=(nbytes(zin) + nbytes(w1) + nbytes(b1) + nbytes(w2)
                        + nbytes(b2) + Bp * D * jnp.dtype(mean_dtype).itemsize),
    )

    mean_flat = pl.pallas_call(
        gaussian_decoder_kernel,
        out_shape=jax.ShapeDtypeStruct((Bp, D), mean_dtype),
        grid_spec=pltpu.PrefetchScalarGridSpec(
            num_scalar_prefetch=0,
            grid=grid,
            in_specs=[
                pl.BlockSpec((TB, M), lambda i: (i, 0)),   # z: batch-tiled
                pl.BlockSpec((M, H), lambda i: (0, 0)),    # weights VMEM-resident
                pl.BlockSpec((1, H), lambda i: (0, 0)),
                pl.BlockSpec((H, D), lambda i: (0, 0)),
                pl.BlockSpec((1, D), lambda i: (0, 0)),
            ],
            out_specs=pl.BlockSpec((TB, D), lambda i: (i, 0)),
        ),
        compiler_params=pltpu.CompilerParams(
            dimension_semantics=("parallel",),             # shard batch across TCs
            vmem_limit_bytes=32 * 1024 * 1024,
        ),
        cost_estimate=cost,
    )(zin, w1, b1, w2, b2)

    mean_flat = mean_flat if Bp == B else mean_flat[:B]
    mean = mean_flat.reshape(B, 28, 28)                    # free contiguous view
    # scale = exp(log_std) is batch-independent: compute once, outside the kernel.
    scale = jnp.exp(log_std)
    return mean, scale


def reference_forward(z, w1, b1, w2, b2, log_std):
    # True f32 semantics of the PyTorch module (decoder_net = Linear/ReLU/Linear).
    h = jnp.maximum(z @ w1 + b1.reshape(1, -1), 0.0)
    mean = h @ w2 + b2.reshape(1, -1)
    return mean.reshape(z.shape[0], 28, 28), jnp.exp(log_std)


if __name__ == "__main__":
    B, M, H, D = 8, 8, 128, 28 * 28

    key = jax.random.PRNGKey(0)
    kz, k1, k2, k3, k4 = jax.random.split(key, 5)

    # Deterministic synthetic decoder_net parameters + log_std.
    z = jax.random.normal(kz, (B, M), dtype=jnp.float32)
    w1 = jax.random.normal(k1, (M, H), dtype=jnp.float32) * 0.1
    b1 = jax.random.normal(k2, (H,), dtype=jnp.float32) * 0.01
    w2 = jax.random.normal(k3, (H, D), dtype=jnp.float32) * 0.1
    b2 = jax.random.normal(k4, (D,), dtype=jnp.float32) * 0.01
    log_std = jnp.zeros((28, 28), dtype=jnp.float32)       # torch.full((28,28), 0.0)

    # Parameter preprocessing happens exactly once (not per forward call).
    params = prepare_gaussian_decoder_params(w1, b1, w2, b2)

    mean, scale = gaussian_decoder_forward(z, params, log_std)
    jax.block_until_ready((mean, scale))

    ref_mean, ref_scale = reference_forward(z, w1, b1, w2, b2, log_std)
    assert mean.shape == (B, 28, 28) and scale.shape == (28, 28)
    # bf16 MXU operands with f32 accumulation: ~0.3% relative error vs pure f32.
    assert jnp.allclose(mean, ref_mean, atol=2e-2, rtol=2e-2), (
        float(jnp.max(jnp.abs(mean - ref_mean))))
    assert jnp.allclose(scale, ref_scale, atol=1e-6, rtol=1e-6)

    # TODO(synk): td.Independent(td.Normal(...), 2) sampling / log_prob is a
    # distribution-object API with no Pallas equivalent; we return (mean, scale).
    print("KERNEL_OK")
</pallas_src>

<mosaic_0001>
module attributes {stable_mosaic.version = 11 : i64} {
  func.func @gaussian_decoder_kernel(%arg0: i32, %arg1: memref<8x8xf32, #tpu.memory_space<vmem>>, %arg2: memref<8x128xbf16, #tpu.memory_space<vmem>>, %arg3: memref<1x128xf32, #tpu.memory_space<vmem>>, %arg4: memref<128x784xbf16, #tpu.memory_space<vmem>>, %arg5: memref<1x784xf32, #tpu.memory_space<vmem>>, %arg6: memref<8x784xf32, #tpu.memory_space<vmem>>) attributes {dimension_semantics = [#tpu.dimension_semantics<parallel>], iteration_bounds = array<i64: 1>, scalar_prefetch = 0 : i64, scratch_operands = 0 : i64, tpu.core_type = #tpu.core_type<tc>, window_params = [{transform_indices = @transform_0, window_bounds = array<i64: 8, 8>}, {pipeline_mode = #tpu.pipeline_mode<synchronous>, transform_indices = @transform_1, window_bounds = array<i64: 8, 128>}, {pipeline_mode = #tpu.pipeline_mode<synchronous>, transform_indices = @transform_2, window_bounds = array<i64: 1, 128>}, {pipeline_mode = #tpu.pipeline_mode<synchronous>, transform_indices = @transform_3, window_bounds = array<i64: 128, 784>}, {pipeline_mode = #tpu.pipeline_mode<synchronous>, transform_indices = @transform_4, window_bounds = array<i64: 1, 784>}, {transform_indices = @transform_5, window_bounds = array<i64: 8, 784>}]} {
    %c0 = arith.constant 0 : index
    %c0_0 = arith.constant 0 : index
    %0 = vector.load %arg1[%c0, %c0_0] : memref<8x8xf32, #tpu.memory_space<vmem>>, vector<8x8xf32>
    %1 = arith.truncf %0 : vector<8x8xf32> to vector<8x8xbf16>
    %c0_1 = arith.constant 0 : index
    %c0_2 = arith.constant 0 : index
    %2 = vector.load %arg2[%c0_1, %c0_2] : memref<8x128xbf16, #tpu.memory_space<vmem>>, vector<8x128xbf16>
    %cst = arith.constant dense<0.000000e+00> : vector<8x128xf32>
    %3 = tpu.matmul %1, %2, %cst {dimension_numbers = #tpu.dot_dimension_numbers<[1], [0], [0], [1], [0, 0, 1, 1], [], []>} : vector<8x8xbf16>, vector<8x128xbf16>, vector<8x128xf32> -> vector<8x128xf32>
    %c0_3 = arith.constant 0 : index
    %c0_4 = arith.constant 0 : index
    %4 = vector.load %arg3[%c0_3, %c0_4] : memref<1x128xf32, #tpu.memory_space<vmem>>, vector<1x128xf32>
    %5 = vector.broadcast %4 : vector<1x128xf32> to vector<8x128xf32>
    %6 = arith.addf %3, %5 : vector<8x128xf32>
    %cst_5 = arith.constant 0.000000e+00 : f32
    %7 = vector.broadcast %cst_5 : f32 to vector<8x128xf32>
    %8 = arith.maximumf %6, %7 : vector<8x128xf32>
    %9 = arith.truncf %8 : vector<8x128xf32> to vector<8x128xbf16>
    %c0_6 = arith.constant 0 : index
    %c0_7 = arith.constant 0 : index
    %10 = vector.load %arg4[%c0_6, %c0_7] : memref<128x784xbf16, #tpu.memory_space<vmem>>, vector<128x784xbf16>
    %cst_8 = arith.constant dense<0.000000e+00> : vector<8x784xf32>
    %11 = tpu.matmul %9, %10, %cst_8 {dimension_numbers = #tpu.dot_dimension_numbers<[1], [0], [0], [1], [0, 0, 1, 1], [], []>} : vector<8x128xbf16>, vector<128x784xbf16>, vector<8x784xf32> -> vector<8x784xf32>
    %c0_9 = arith.constant 0 : index
    %c0_10 = arith.constant 0 : index
    %12 = vector.load %arg5[%c0_9, %c0_10] : memref<1x784xf32, #tpu.memory_space<vmem>>, vector<1x784xf32>
    %13 = vector.broadcast %12 : vector<1x784xf32> to vector<8x784xf32>
    %14 = arith.addf %11, %13 : vector<8x784xf32>
    %c0_11 = arith.constant 0 : index
    %c0_12 = arith.constant 0 : index
    %15 = vector.load %arg6[%c0_11, %c0_12] : memref<8x784xf32, #tpu.memory_space<vmem>>, vector<8x784xf32>
    tpu.vector_store %arg6[%c0_11, %c0_12], %14 {strides = array<i32>} : memref<8x784xf32, #tpu.memory_space<vmem>>, vector<8x784xf32>,
    return
  }
  func.func @transform_0(%arg0: i32) -> (i32, i32) {
    %c0_i32 = arith.constant 0 : i32
    %c0_i32_0 = arith.constant 0 : i32
    return %arg0, %c0_i32 : i32, i32
  }
  func.func @transform_1(%arg0: i32) -> (i32, i32) {
    %c0_i32 = arith.constant 0 : i32
    %c0_i32_0 = arith.constant 0 : i32
    %c0_i32_1 = arith.constant 0 : i32
    return %c0_i32, %c0_i32_0 : i32, i32
  }
  func.func @transform_2(%arg0: i32) -> (i32, i32) {
    %c0_i32 = arith.constant 0 : i32
    %c0_i32_0 = arith.constant 0 : i32
    %c0_i32_1 = arith.constant 0 : i32
    return %c0_i32, %c0_i32_0 : i32, i32
  }
  func.func @transform_3(%arg0: i32) -> (i32, i32) {
    %c0_i32 = arith.constant 0 : i32
    %c0_i32_0 = arith.constant 0 : i32
    %c0_i32_1 = arith.constant 0 : i32
    return %c0_i32, %c0_i32_0 : i32, i32
  }
  func.func @transform_4(%arg0: i32) -> (i32, i32) {
    %c0_i32 = arith.constant 0 : i32
    %c0_i32_0 = arith.constant 0 : i32
    %c0_i32_1 = arith.constant 0 : i32
    return %c0_i32, %c0_i32_0 : i32, i32
  }
  func.func @transform_5(%arg0: i32) -> (i32, i32) {
    %c0_i32 = arith.constant 0 : i32
    %c0_i32_0 = arith.constant 0 : i32
    return %arg0, %c0_i32 : i32, i32
  }
}

</mosaic_0001>

<bundles_post_ra>
// kernel: tpu_custom_call.1
= control target key start
LH: loop header
LB: loop body
LE: loop exit
PB: predicated region body
PF: predicated region fallthrough
CT: control target
= control target key end

     0   :  { %vm36_vm0 = vcmask 1043456   ;;  %v859_v2 = vmov 0.0   ;;  %vm860_vm1 = vmmov 0   ;;  %vm32_vm2 = vcmask 64512   ;;  %s1098_s0 = inlined_call_operand.vmem [shape: f32[8,8], index: 0, kind: input, shape index: {}]   ;;  %s1099_s1 = inlined_call_operand.vmem [shape: bf16[8,128], index: 1, kind: input, shape index: {}]   ;;  %s1100_s2 = inlined_call_operand.vmem [shape: f32[1,128], index: 2, kind: input, shape index: {}]   ;;  %s1101_s3 = inlined_call_operand.vmem [shape: bf16[128,784], index: 3, kind: input, shape index: {}]   ;;  %s1102_s4 = inlined_call_operand.vmem [shape: f32[1,784], index: 4, kind: input, shape index: {}]   ;;  %s1103_s5 = inlined_call_operand.hbm [shape: f32[8,784], index: 5, kind: output, shape index: {}]  }
   0x1   :  { %v24_v0 = vld [vmem:[%s1099_s1] sm:$0xf]  ;;  %725 = vmatprep.subr.bf16.mxu0 %v859_v2  ;;  %727 = vmatprep.mubr.msk.bf16.mxu0 %vm860_vm1, %v859_v2  ;;  %v757_v6 = vld [vmem:[%s1101_s3 + $0x8] ss:$28 sps:$4 sm:$0xff]   ;;  %v761_v9 = vld [vmem:[%s1101_s3 + $0x3c] ss:$28 sps:$4 sm:$0xff]  }
   0x2   :  { %v22_v1 = vld [vmem:[%s1098_s0] sm:$0xff]  ;;  %v38_v3 = vsel %vm36_vm0, %v24_v0, 0  ;;  %v759_v7 = vld [vmem:[%s1101_s3 + $0xc] ss:$28 sps:$4 sm:$0xff]   ;;  %v766_v12 = vld [vmem:[%s1101_s3 + $0x38] ss:$28 sps:$4 sm:$0xff]  }
   0x3   :  { %v23_v4 = vpack.c.bf16 %v22_v1, %v22_v1  ;;  %v755_v5 = vld [vmem:[%s1101_s3 + $0x4] ss:$28 sps:$4 sm:$0xff]   ;;  %726 = vmatpush3.bf16.msra.mxu0 %v38_v3  ;;  %v767_v13 = vld [vmem:[%s1101_s3 + $0x74] ss:$28 sps:$4 sm:$0xff]   ;;  %v771_v14 = vld [vmem:[%s1101_s3 + $0x7c] ss:$28 sps:$4 sm:$0xff]  }
   0x4   :  { %471 = vmatprep.subr.bf16.mxu1 %v755_v5  ;;  %v760_v8 = vld [vmem:[%s1101_s3] ss:$28 sps:$4 sm:$0xff]   ;;  %512 = vmatprep.subr.bf16.mxu0 %v759_v7  ;;  %v769_v15 = vld [vmem:[%s1101_s3 + $0x78] ss:$28 sps:$4 sm:$0xff]   ;;  %v772_v16 = vld [vmem:[%s1101_s3 + $0x70] ss:$28 sps:$4 sm:$0xff]  }
   0x5   :  { %v763_v10 = vld [vmem:[%s1101_s3 + $0x40] ss:$28 sps:$4 sm:$0xff]   ;;  %472 = vmatpush1.bf16.msra.mxu1 %v760_v8  ;;  %v773_v17 = vld [vmem:[%s1101_s3 + $0xac] ss:$28 sps:$4 sm:$0xff]   ;;  %v777_v18 = vld [vmem:[%s1101_s3 + $0xb4] ss:$28 sps:$4 sm:$0xff]  }
   0x6   :  { %728 = vmatmul.mubr.msk.bf16.vlgmr.msra.gmra.mrb[0].mxu0 %vm32_vm2, %v23_v4  ;;  %v765_v11 = vld [vmem:[%s1101_s3 + $0x44] ss:$28 sps:$4 sm:$0xff]   ;;  %473 = vmatprep.subr.bf16.mxu1 %v761_v9  ;;  %v775_v19 = vld [vmem:[%s1101_s3 + $0xb0] ss:$28 sps:$4 sm:$0xff]   ;;  %v785_v25 = vld [vmem:[%s1101_s3 + $0x11c] ss:$28 sps:$4 sm:$0xff]  }
   0x7   :  { %513 = vmatpush1.bf16.msra.mxu0 %v757_v6  ;;  %v778_v20 = vld [vmem:[%s1101_s3 + $0xa8] ss:$28 sps:$4 sm:$0xff]   ;;  %v784_v24 = vld [vmem:[%s1101_s3 + $0xe0] ss:$28 sps:$4 sm:$0xff]   ;;  %v790_v28 = vld [vmem:[%s1101_s3 + $0x118] ss:$28 sps:$4 sm:$0xff]  }
   0x8   :  { %514 = vmatprep.subr.bf16.mxu0 %v765_v11  ;;  %v779_v21 = vld [vmem:[%s1101_s3 + $0xe4] ss:$28 sps:$4 sm:$0xff]   ;;  %v783_v22 = vld [vmem:[%s1101_s3 + $0xec] ss:$28 sps:$4 sm:$0xff]   ;;  %v791_v29 = vld [vmem:[%s1101_s3 + $0x154] ss:$28 sps:$4 sm:$0xff]  }
   0x9   :  { %474 = vmatpush1.bf16.msra.mxu1 %v766_v12  ;;  %v781_v23 = vld [vmem:[%s1101_s3 + $0xe8] ss:$28 sps:$4 sm:$0xff]   ;;  %v787_v27 = vld [vmem:[%s1101_s3 + $0x120] ss:$28 sps:$4 sm:$0xff]   ;;  %v793_v31 = vld [vmem:[%s1101_s3 + $0x158] ss:$28 sps:$4 sm:$0xff]  }
   0xa   :  { %475 = vmatprep.subr.bf16.mxu1 %v767_v13  ;;  %v789_v26 = vld [vmem:[%s1101_s3 + $0x124] ss:$28 sps:$4 sm:$0xff]   ;;  %v795_v30 = vld [vmem:[%s1101_s3 + $0x15c] ss:$28 sps:$4 sm:$0xff]   ;;  %v796_v32 = vld [vmem:[%s1101_s3 + $0x150] ss:$28 sps:$4 sm:$0xff]  }
   0xb   :  { %515 = vmatpush1.bf16.msra.mxu0 %v763_v10 }
   0xc   :  { %516 = vmatprep.subr.bf16.mxu0 %v771_v14 }
   0xd   :  { %476 = vmatpush1.bf16.msra.mxu1 %v772_v16 }
   0xe   :  { %477 = vmatprep.subr.bf16.mxu1 %v773_v17 }
   0xf   :  { %517 = vmatpush1.bf16.msra.mxu0 %v769_v15 }
  0x10   :  { %518 = vmatprep.subr.bf16.mxu0 %v777_v18 }
  0x11   :  { %478 = vmatpush1.bf16.msra.mxu1 %v778_v20 }
  0x12   :  { %479 = vmatprep.subr.bf16.mxu1 %v779_v21 }
  0x13   :  { %519 = vmatpush1.bf16.msra.mxu0 %v775_v19 }
  0x14   :  { %520 = vmatprep.subr.bf16.mxu0 %v783_v22 }
  0x15   :  { %480 = vmatpush1.bf16.msra.mxu1 %v784_v24 }
  0x16   :  { %481 = vmatprep.subr.bf16.mxu1 %v785_v25 }
  0x17   :  { %521 = vmatpush1.bf16.msra.mxu0 %v781_v23 }
  0x18   :  { %522 = vmatprep.subr.bf16.mxu0 %v789_v26 }
  0x19   :  { %482 = vmatpush1.bf16.msra.mxu1 %v790_v28 }
  0x1a   :  { %483 = vmatprep.subr.bf16.mxu1 %v791_v29 }
  0x1b   :  { %523 = vmatpush1.bf16.msra.mxu0 %v787_v27 }
  0x1c   :  { %524 = vmatprep.subr.bf16.mxu0 %v795_v30 }
  0x1d   :  { %484 = vmatpush1.bf16.msra.mxu1 %v796_v32 }
  0x1f   :  { %525 = vmatpush1.bf16.msra.mxu0 %v793_v31 }
  0x20   :  { %10 = vsyncpa [#allocation3], 0  ;;  %v797_v33 = vld [vmem:[%s1101_s3 + $0x18c] ss:$28 sps:$4 sm:$0xff]   ;;  %v801_v34 = vld [vmem:[%s1101_s3 + $0x194] ss:$28 sps:$4 sm:$0xff]   ;;  %v148_v7 = vlaneseq }
  0x21   :  { %v799_v35 = vld [vmem:[%s1101_s3 + $0x190] ss:$28 sps:$4 sm:$0xff]   ;;  %v802_v36 = vld [vmem:[%s1101_s3 + $0x188] ss:$28 sps:$4 sm:$0xff]   ;;  %485 = vmatprep.subr.bf16.mxu1 %v797_v33  ;;  %526 = vmatprep.subr.bf16.mxu0 %v801_v34  ;;  %v861_v38 = vmov 0   ;;  %vm640_vm3 = vcmask 130048  }
  0x22   :  { %486 = vmatpush1.bf16.msra.mxu1 %v802_v36  ;;  %v805_v37 = vld [vmem:[%s1101_s3 + $0x14] ss:$28 sps:$4 sm:$0xff]   ;;  %503 = vmatprep.mubr.bf16.mxu1 %v861_v38  ;;  %v656_v39 = vld [vmem:[%s1100_s2] ss:$0 sm:$0xff]  ;;  %v809_v49 = vld [vmem:[%s1101_s3 + $0x4c] ss:$28 sps:$4 sm:$0xff]  }
  0x23   :  { %527 = vmatpush1.bf16.msra.mxu0 %v799_v35  ;;  %544 = vmatprep.mubr.bf16.mxu0 %v861_v38  ;;  %v803_v46 = vld [vmem:[%s1101_s3 + $0x10] ss:$28 sps:$4 sm:$0xff]   ;;  %v806_v47 = vld [vmem:[%s1101_s3 + $0x18] ss:$28 sps:$4 sm:$0xff]   ;;  %v807_v50 = vld [vmem:[%s1101_s3 + $0x48] ss:$28 sps:$4 sm:$0xff]  }
  0x24   :  { %731 = vmatprep.subr.bf16.mxu0 %v859_v2  ;;  %553 = vmatprep.subr.bf16.mxu1 %v805_v37  ;;  %v810_v51 = vld [vmem:[%s1101_s3 + $0x50] ss:$28 sps:$4 sm:$0xff]   ;;  %v813_v52 = vld [vmem:[%s1101_s3 + $0x84] ss:$28 sps:$4 sm:$0xff]   ;;  %v817_v55 = vld [vmem:[%s1101_s3 + $0xbc] ss:$28 sps:$4 sm:$0xff]  }
  0x25   :  { %v811_v53 = vld [vmem:[%s1101_s3 + $0x80] ss:$28 sps:$4 sm:$0xff]   ;;  %v814_v54 = vld [vmem:[%s1101_s3 + $0x88] ss:$28 sps:$4 sm:$0xff]   ;;  %v815_v56 = vld [vmem:[%s1101_s3 + $0xb8] ss:$28 sps:$4 sm:$0xff]  }
  0x26   :  { %v818_v57 = vld [vmem:[%s1101_s3 + $0xc0] ss:$28 sps:$4 sm:$0xff]   ;;  %v821_v58 = vld [vmem:[%s1101_s3 + $0xf4] ss:$28 sps:$4 sm:$0xff]   ;;  %v825_v61 = vld [vmem:[%s1101_s3 + $0x12c] ss:$28 sps:$4 sm:$0xff]  }
  0x27   :  { %v819_v59 = vld [vmem:[%s1101_s3 + $0xf0] ss:$28 sps:$4 sm:$0xff]   ;;  %v822_v60 = vld [vmem:[%s1101_s3 + $0xf8] ss:$28 sps:$4 sm:$0xff]   ;;  %v823_v62 = vld [vmem:[%s1101_s3 + $0x128] ss:$28 sps:$4 sm:$0xff]  }
  0x28   :  { %v826_v63 = vld [vmem:[%s1101_s3 + $0x130] ss:$28 sps:$4 sm:$0xff]   ;;  %v829_v0 = vld [vmem:[%s1101_s3 + $0x164] ss:$28 sps:$4 sm:$0xff]   ;;  %v833_v4 = vld [vmem:[%s1101_s3 + $0x19c] ss:$28 sps:$4 sm:$0xff]  }
  0x29   :  { %v827_v1 = vld [vmem:[%s1101_s3 + $0x160] ss:$28 sps:$4 sm:$0xff]   ;;  %v830_v3 = vld [vmem:[%s1101_s3 + $0x168] ss:$28 sps:$4 sm:$0xff]   ;;  %v831_v5 = vld [vmem:[%s1101_s3 + $0x198] ss:$28 sps:$4 sm:$0xff]  }
  0x2a   :  { %v834_v6 = vld [vmem:[%s1101_s3 + $0x1a0] ss:$28 sps:$4 sm:$0xff]   ;;  %v149_v8 = vshrl.u32 %v148_v7, 7  ;;  %s862_s3 = smov [#allocation2]  }
  0x2b   :  { %v146_v11 = vld [vmem:[%s1102_s4] sm:$0x7f]  ;;  %s648_s4 = sshll.u32 %s862_s3, 4  ;;  %s649_s4 = int_to_ptr.vmem [resolvable:$true] %s648_s4 }
  0x2c   :  { %v150_v9 = vsub.s32 0, %v149_v8  ;;  %v158_v10 = vsub.s32 2, %v149_v8  ;;  %v154_v12 = vsub.s32 1, %v149_v8  ;;  %v162_v13 = vsub.s32 3, %v149_v8  ;;  %s835_s26 = scalar_lea.vmem %s649_s4, 896  ;;  %p840_p1 = scmp.lt.s32.totalorder %s649_s4, %s649_s4 }
  0x2d   :  { %v166_v29 = vsub.s32 4, %v149_v8  ;;  %v174_v30 = vsub.s32 6, %v149_v8  ;;  %v170_v31 = vsub.s32 5, %v149_v8  ;;  %p836_p0 = scmp.ne.s32.totalorder %s649_s4, %s835_s26  ;;  %p841_p2 = scmp.lt.s32.totalorder %s835_s26, %s835_s26 }
  0x2e   :  { %v151_v14 = vrot.slane %v146_v11, %v150_v9  ;;  %v159_v15 = vrot.slane %v146_v11, %v158_v10  ;;  %v155_v16 = vrot.slane %v146_v11, %v154_v12  ;;  %v163_v17 = vrot.slane %v146_v11, %v162_v13 }
  0x2f   :  { %v167_v32 = vrot.slane %v146_v11, %v166_v29  ;;  %v175_v33 = vrot.slane %v146_v11, %v174_v30  ;;  %v171_v34 = vrot.slane %v146_v11, %v170_v31  ;;  %p842_p3 = por %p841_p2, %p840_p1 }
  0x31   :  { %p843_p4 = pnand %p842_p3, %p836_p0 }
  0xd9   :  { %v74_v40 = vpop.f32.mrb[0].mxu0 }
  0xda   :  { %v75_v41 = vadd.f32 %v656_v39, %v74_v40  ;;  %v729_v42 = vpop.f32.mrb[1].mxu0 }
  0xdb   :  { %v77_v43 = vpop.f32.mrb[2].mxu0 }
  0xdc   :  { %v80_v44 = vmax.f32 %v75_v41, 0.0  ;;  %v730_v45 = vpop.f32.mrb[3].mxu0 }
  0xde   :  { %v81_v48 = vpack.c.bf16 %v80_v44, %v80_v44 }
  0xe0   :  { %504 = vmatmul.mubr.bf16.vlgmr.msra.gmra.mrb[0].mxu1 %v81_v48  ;;  %545 = vmatmul.mubr.bf16.vlgmr.msra.gmra.mrb[4].mxu0 %v81_v48 }
  0xe1   :  { %554 = vmatpush1.bf16.msra.mxu1 %v803_v46  ;;  %732 = vmatpush3.bf16.msra.mxu0 %v806_v47 }
  0xe2   :  { %555 = vmatprep.subr.bf16.mxu1 %v809_v49  ;;  %733 = vmatprep.subr.bf16.mxu0 %v859_v2 }
  0xe3   :  { %585 = vmatprep.mubr.bf16.mxu1 %v861_v38  ;;  %747 = vmatprep.mubr.msk.bf16.mxu0 %vm860_vm1, %v859_v2 }
  0xe5   :  { %556 = vmatpush1.bf16.msra.mxu1 %v807_v50  ;;  %734 = vmatpush3.bf16.msra.mxu0 %v810_v51 }
  0xe6   :  { %557 = vmatprep.subr.bf16.mxu1 %v813_v52  ;;  %735 = vmatprep.subr.bf16.mxu0 %v859_v2 }
  0xe9   :  { %558 = vmatpush1.bf16.msra.mxu1 %v811_v53  ;;  %736 = vmatpush3.bf16.msra.mxu0 %v814_v54 }
  0xea   :  { %559 = vmatprep.subr.bf16.mxu1 %v817_v55  ;;  %737 = vmatprep.subr.bf16.mxu0 %v859_v2 }
  0xed   :  { %560 = vmatpush1.bf16.msra.mxu1 %v815_v56  ;;  %738 = vmatpush3.bf16.msra.mxu0 %v818_v57 }
  0xee   :  { %561 = vmatprep.subr.bf16.mxu1 %v821_v58  ;;  %739 = vmatprep.subr.bf16.mxu0 %v859_v2 }
  0xf1   :  { %562 = vmatpush1.bf16.msra.mxu1 %v819_v59  ;;  %740 = vmatpush3.bf16.msra.mxu0 %v822_v60 }
  0xf2   :  { %563 = vmatprep.subr.bf16.mxu1 %v825_v61  ;;  %741 = vmatprep.subr.bf16.mxu0 %v859_v2 }
  0xf5   :  { %564 = vmatpush1.bf16.msra.mxu1 %v823_v62  ;;  %742 = vmatpush3.bf16.msra.mxu0 %v826_v63 }
  0xf6   :  { %565 = vmatprep.subr.bf16.mxu1 %v829_v0  ;;  %743 = vmatprep.subr.bf16.mxu0 %v859_v2 }
  0xf9   :  { %566 = vmatpush1.bf16.msra.mxu1 %v827_v1  ;;  %744 = vmatpush3.bf16.msra.mxu0 %v830_v3 }
  0xfa   :  { %567 = vmatprep.subr.bf16.mxu1 %v833_v4  ;;  %745 = vmatprep.subr.bf16.mxu0 %v859_v2 }
  0xfd   :  { %568 = vmatpush1.bf16.msra.mxu1 %v831_v5  ;;  %746 = vmatpush3.bf16.msra.mxu0 %v834_v6 }
 0x100   :  { %586 = vmatmul.mubr.bf16.vlgmr.msra.gmra.mrb[4].mxu1 %v81_v48  ;;  %748 = vmatmul.mubr.bf16.vlgmr.msra.gmra.mrb[8].mxu0 %v81_v48 }
 0x1b3   :  { %v505_v18 = vpop.f32.mrb[0].mxu1  ;;  %v546_v2 = vpop.f32.mrb[4].mxu0 }
 0x1b4   :  { %v506_v19 = vadd.f32 %v505_v18, %v151_v14  ;;  %v547_v20 = vadd.f32 %v546_v2, %v159_v15  ;;  %v507_v21 = vpop.f32.mrb[1].mxu1  ;;  %v548_v22 = vpop.f32.mrb[5].mxu0 }
 0x1b5   :  { %v508_v23 = vadd.f32 %v507_v21, %v155_v16  ;;  %v549_v24 = vadd.f32 %v548_v22, %v163_v17  ;;  %v509_v25 = vpop.f32.mrb[2].mxu1  ;;  %v550_v26 = vpop.f32.mrb[6].mxu0 }
 0x1b6   :  { %634 = vst [vmem:[#allocation2] sm:$0xff] %v506_v19  ;;  %636 = vst [vmem:[#allocation2 + $0x10] sm:$0xff] %v547_v20  ;;  %v510_v27 = vpop.f32.mrb[3].mxu1  ;;  %v551_v28 = vpop.f32.mrb[7].mxu0 }
 0x1b7   :  { %635 = vst [vmem:[#allocation2 + $0x8] sm:$0xff] %v508_v23  ;;  %637 = vst [vmem:[#allocation2 + $0x18] sm:$0xff] %v549_v24 }
 0x1d3   :  { %v587_v35 = vpop.f32.mrb[4].mxu1  ;;  %v628_v36 = vpop.f32.mrb[8].mxu0 }
 0x1d4   :  { %v588_v37 = vadd.f32 %v587_v35, %v167_v32  ;;  %v629_v38 = vadd.f32 %v628_v36, %v175_v33  ;;  %v589_v39 = vpop.f32.mrb[5].mxu1  ;;  %v749_v40 = vpop.f32.mrb[9].mxu0 }
 0x1d5   :  { %v590_v41 = vadd.f32 %v589_v39, %v171_v34  ;;  %v591_v42 = vpop.f32.mrb[6].mxu1  ;;  %v631_v43 = vpop.f32.mrb[10].mxu0 }
 0x1d6   :  { %638 = vst [vmem:[#allocation2 + $0x20] sm:$0xff] %v588_v37  ;;  %641 = vst.msk [vmem:[#allocation2 + $0x30] sm:$0xff] %vm640_vm3, %v629_v38  ;;  %v592_v44 = vpop.f32.mrb[7].mxu1  ;;  %v750_v45 = vpop.f32.mrb[11].mxu0 }
 0x1d7   :  { %639 = vst [vmem:[#allocation2 + $0x28] sm:$0xff] %v590_v41 }
 0x1d8   :  { %846 = shalt.err (!%p843_p4)
}
 0x1d9   :  { %s847_s29 = scalar_lea.hbm %s1103_s5, 896 }
 0x1da   :  { %p848_p5 = scmp.ne.s32.totalorder %s1103_s5, %s847_s29  ;;  %p851_p6 = scmp.lt.u32.totalorder %s847_s29, %s1103_s5 }
 0x1dc   :  { %p853_p7 = pnand %p851_p6, %p848_p5 }
 0x1de   :  { %856 = shalt.err (!%p853_p7)
}
 0x1df   :  { %651 = dma.vmem_to_hbm [thread:$0]  %s649_s4, 896, %s1103_s5, [#allocation3]  }
 0x1e0   :  { %857 = dma.done.wait [#allocation3], 896  }
 0x1e1   :  { %858 = vsyncadd [#allocation3], 4294966400 }
 0x1e2   :  { %655 = vsyncpa [#allocation3], 1 }

</bundles_post_ra>
